<compile_context>
chip_gen: v7x
topology: tpu7x:2x2x1
jax: 0.10.0
libtpu: 0.0.40
codegen_flags: <defaults>
</compile_context>

<pallas_src>
import jax
import jax.numpy as jnp
from jax.experimental import pallas as pl
from jax.experimental.pallas import tpu as pltpu

LEAKY_SLOPE = 0.01                       # PyTorch F.leaky_relu default
_LANES = 128
_TARGET_TILE_BYTES = 4 * 1024 * 1024     # x-tile byte target (v7x-safe floor)


def _round_up(x: int, m: int) -> int:
    return ((x + m - 1) // m) * m


def _vmem_capacity_bytes() -> int:
    """Physical VMEM of the current TPU generation, conservative fallback."""
    try:
        cap = getattr(pltpu.get_tpu_info(), "vmem_capacity_bytes", None)
        if cap:
            return int(cap)
    except Exception:
        pass
    return 64 * 1024 * 1024              # v7x per-core VMEM (smallest gen)


def mlp2_kernel(x_ref, w_ref, b_ref, o_ref):
    # x_ref: (TB, n_mlp) VMEM    w_ref: (2, n_mlp) VMEM (resident)
    # b_ref: (2, 1)      VMEM    o_ref: (2, TB)    VMEM (lane-dense output)
    x = x_ref[...]
    w = w_ref[...]

    # logits^T = W @ x^T : contract the feature (lane) axis of both operands
    # on the MXU with f32 accumulation.  (2, n_mlp) x (TB, n_mlp) -> (2, TB).
    # Same dimension numbers as the flash-attention q@k^T pattern -> native
    # transposed-RHS matmul, no XLU transpose of the full x tile.
    logits_t = jax.lax.dot_general(
        w, x, (((1,), (1,)), ((), ())), preferred_element_type=jnp.float32)

    # Bias add (lane-broadcast of the (2,1) column) + LeakyReLU on the full
    # (2, TB) block: half the vreg traffic of per-class-row processing.
    z = logits_t + b_ref[...]
    a = jnp.where(z >= 0, z, LEAKY_SLOPE * z)

    # Numerically stable 2-class softmax as pure elementwise ops (no XLU
    # cross-lane reduce needed for just two classes).
    a0 = a[0:1, :]
    a1 = a[1:2, :]
    m = jnp.maximum(a0, a1)
    e0 = jnp.exp(a0 - m)
    e1 = jnp.exp(a1 - m)
    denom = e0 + e1                                # in [1, 2]
    inv = pl.reciprocal(denom, approx=True)        # EUP slot (nearly free)
    inv = inv * (2.0 - denom * inv)                # one Newton step -> ~f32

    o_ref[0:1, :] = (e0 * inv).astype(o_ref.dtype)
    o_ref[1:2, :] = (e1 * inv).astype(o_ref.dtype)


def mlp2_forward(x, weight, bias, *, block_rows=None):
    """x: (B, n_mlp); weight: (2, n_mlp) (PyTorch nn.Linear layout); bias: (2,).

    Returns softmax(leaky_relu(x @ weight.T + bias), axis=1), shape (B, 2).
    `block_rows` optionally forces a batch-tile size (tests / tuning).
    """
    B, n_mlp = x.shape
    assert weight.shape == (2, n_mlp), weight.shape
    assert bias.shape == (2,), bias.shape

    itemsize = jnp.dtype(x.dtype).itemsize
    bytes_per_row = n_mlp * itemsize
    vmem_cap = _vmem_capacity_bytes()

    # ---- Batch-tile sizing (all 128-aligned so the (2, TB) output block is
    # lane-dense and the x block satisfies the (8,128) constraint). ----------
    # (a) Byte-targeted tile: ~4 MiB on v7x, up to ~8 MiB on 128 MiB parts.
    tile_bytes = max(_TARGET_TILE_BYTES, min(8 * 1024 * 1024, vmem_cap // 16))
    rows_by_bytes = max(_LANES,
                        (tile_bytes // bytes_per_row) // _LANES * _LANES)
    # (b) Keep >= 4 grid steps for large batches so v7x's two TensorCores both
    #     get work on the "parallel" axis (irrelevant on 1-core v5e/v6e).
    rows_for_split = _round_up(pl.cdiv(B, 4), _LANES)
    # (c) Never larger than the (128-aligned) batch itself.
    TB = min(rows_by_bytes, rows_for_split, _round_up(B, _LANES))
    if block_rows is not None:
        TB = _round_up(min(block_rows, _round_up(B, _LANES)), _LANES)

    # Ragged grid: no jnp.pad HBM copy; Pallas masks the last tile's
    # out-of-bounds rows on read and drops them on writeback.
    num_tiles = pl.cdiv(B, TB)

    # Generation-aware scoped-VMEM limit: ~96 MiB on 128 MiB parts, 48 MiB on
    # v7x's 64 MiB physical VMEM.
    vmem_limit = max(32 * 1024 * 1024,
                     min((vmem_cap * 3) // 4, 96 * 1024 * 1024))

    out_t = pl.pallas_call(
        mlp2_kernel,
        out_shape=jax.ShapeDtypeStruct((2, B), x.dtype),
        grid=(num_tiles,),
        in_specs=[
            # x: one batch tile per grid step (default double-buffered DMA is
            # enough for a pure streaming pipeline).
            pl.BlockSpec((TB, n_mlp), lambda i: (i, 0)),
            # weight: constant block -> stays resident in VMEM.
            pl.BlockSpec((2, n_mlp), lambda i: (0, 0)),
            # bias: resident (2, 1) VMEM column.
            pl.BlockSpec((2, 1), lambda i: (0, 0)),
        ],
        # Lane-dense output layout: classes on sublanes, batch on lanes.
        out_specs=pl.BlockSpec((2, TB), lambda i: (0, i)),
        compiler_params=pltpu.CompilerParams(
            dimension_semantics=("parallel",),
            vmem_limit_bytes=vmem_limit,
        ),
    )(x, weight, bias.reshape(2, 1))

    # Back to the PyTorch (B, 2) layout (tiny: 2*B elements).
    return out_t.T


if __name__ == "__main__":
    key = jax.random.PRNGKey(0)
    k_x, k_w, k_b, k_x2 = jax.random.split(key, 4)

    batch, n_mlp = 8, 32

    # Parameters shaped like nn.Linear(n_mlp, 2).
    bound = 1.0 / (n_mlp ** 0.5)
    weight = jax.random.uniform(k_w, (2, n_mlp), jnp.float32, -bound, bound)
    bias = jax.random.uniform(k_b, (2,), jnp.float32, -bound, bound)

    def reference(xv):
        logits = xv @ weight.T + bias
        act = jnp.where(logits >= 0, logits, LEAKY_SLOPE * logits)
        return jax.nn.softmax(act, axis=1)

    # Small case: single ragged tile (block larger than the whole batch).
    x = jax.random.normal(k_x, (batch, n_mlp), jnp.float32)
    out = mlp2_forward(x, weight, bias)
    jax.block_until_ready(out)
    assert out.shape == (batch, 2)
    assert jnp.allclose(out, reference(x), atol=1e-4, rtol=1e-4)

    # Multi-tile case: 3 tiles of 128 rows with a ragged last tile (300 rows),
    # exercising the pipelined grid and masked edge handling with no jnp.pad.
    x2 = jax.random.normal(k_x2, (300, n_mlp), jnp.float32)
    out2 = mlp2_forward(x2, weight, bias, block_rows=128)
    jax.block_until_ready(out2)
    assert out2.shape == (300, 2)
    assert jnp.allclose(out2, reference(x2), atol=1e-4, rtol=1e-4)

    print("KERNEL_OK")
</pallas_src>

<mosaic_0001>
module attributes {stable_mosaic.version = 11 : i64} {
  func.func @mlp2_kernel(%arg0: i32, %arg1: memref<128x32xf32, #tpu.memory_space<vmem>>, %arg2: memref<2x32xf32, #tpu.memory_space<vmem>>, %arg3: memref<2x1xf32, #tpu.memory_space<vmem>>, %arg4: memref<2x128xf32, #tpu.memory_space<vmem>>) attributes {dimension_semantics = [#tpu.dimension_semantics<parallel>], iteration_bounds = array<i64: 1>, scalar_prefetch = 0 : i64, scratch_operands = 0 : i64, tpu.core_type = #tpu.core_type<tc>, window_params = [{transform_indices = @transform_0, window_bounds = array<i64: 128, 32>}, {pipeline_mode = #tpu.pipeline_mode<synchronous>, transform_indices = @transform_1, window_bounds = array<i64: 2, 32>}, {pipeline_mode = #tpu.pipeline_mode<synchronous>, transform_indices = @transform_2, window_bounds = array<i64: 2, 1>}, {transform_indices = @transform_3, window_bounds = array<i64: 2, 128>}]} {
    %c0 = arith.constant 0 : index
    %c0_0 = arith.constant 0 : index
    %0 = vector.load %arg1[%c0, %c0_0] : memref<128x32xf32, #tpu.memory_space<vmem>>, vector<128x32xf32>
    %c0_1 = arith.constant 0 : index
    %c0_2 = arith.constant 0 : index
    %1 = vector.load %arg2[%c0_1, %c0_2] : memref<2x32xf32, #tpu.memory_space<vmem>>, vector<2x32xf32>
    %cst = arith.constant dense<0.000000e+00> : vector<2x128xf32>
    %2 = tpu.matmul %1, %0, %cst {dimension_numbers = #tpu.dot_dimension_numbers<[1], [1], [0], [0], [0, 0, 1, 0], [], []>} : vector<2x32xf32>, vector<128x32xf32>, vector<2x128xf32> -> vector<2x128xf32>
    %c0_3 = arith.constant 0 : index
    %c0_4 = arith.constant 0 : index
    %3 = vector.load %arg3[%c0_3, %c0_4] : memref<2x1xf32, #tpu.memory_space<vmem>>, vector<2x1xf32>
    %4 = vector.broadcast %3 : vector<2x1xf32> to vector<2x128xf32>
    %5 = arith.addf %2, %4 : vector<2x128xf32>
    %cst_5 = arith.constant 0.000000e+00 : f32
    %6 = vector.broadcast %cst_5 : f32 to vector<2x128xf32>
    %7 = arith.cmpf oge, %5, %6 : vector<2x128xf32>
    %cst_6 = arith.constant 0.00999999977 : f32
    %8 = vector.broadcast %cst_6 : f32 to vector<2x128xf32>
    %9 = arith.mulf %8, %5 : vector<2x128xf32>
    %10 = arith.select %7, %5, %9 : vector<2x128xi1>, vector<2x128xf32>
    %11 = vector.extract_strided_slice %10 {offsets = [0, 0], sizes = [1, 128], strides = [1, 1]} : vector<2x128xf32> to vector<1x128xf32>
    %12 = vector.extract_strided_slice %10 {offsets = [1, 0], sizes = [1, 128], strides = [1, 1]} : vector<2x128xf32> to vector<1x128xf32>
    %13 = arith.maximumf %11, %12 : vector<1x128xf32>
    %14 = arith.subf %11, %13 : vector<1x128xf32>
    %15 = math.exp %14 : vector<1x128xf32>
    %16 = arith.subf %12, %13 : vector<1x128xf32>
    %17 = math.exp %16 : vector<1x128xf32>
    %18 = arith.addf %15, %17 : vector<1x128xf32>
    %19 = tpu.reciprocal %18 {approx = true} : vector<1x128xf32> -> vector<1x128xf32>
    %20 = arith.mulf %18, %19 : vector<1x128xf32>
    %cst_7 = arith.constant 2.000000e+00 : f32
    %21 = vector.broadcast %cst_7 : f32 to vector<1x128xf32>
    %22 = arith.subf %21, %20 : vector<1x128xf32>
    %23 = arith.mulf %19, %22 : vector<1x128xf32>
    %24 = arith.mulf %15, %23 : vector<1x128xf32>
    %c0_8 = arith.constant 0 : index
    %c0_9 = arith.constant 0 : index
    %25 = vector.load %arg4[%c0_8, %c0_9] : memref<2x128xf32, #tpu.memory_space<vmem>>, vector<1x128xf32>
    tpu.vector_store %arg4[%c0_8, %c0_9], %24 {strides = array<i32>} : memref<2x128xf32, #tpu.memory_space<vmem>>, vector<1x128xf32>,
    %26 = arith.mulf %17, %23 : vector<1x128xf32>
    %c1 = arith.constant 1 : index
    %c0_10 = arith.constant 0 : index
    %27 = vector.load %arg4[%c1, %c0_10] : memref<2x128xf32, #tpu.memory_space<vmem>>, vector<1x128xf32>
    tpu.vector_store %arg4[%c1, %c0_10], %26 {strides = array<i32>} : memref<2x128xf32, #tpu.memory_space<vmem>>, vector<1x128xf32>,
    return
  }
  func.func @transform_0(%arg0: i32) -> (i32, i32) {
    %c0_i32 = arith.constant 0 : i32
    %c0_i32_0 = arith.constant 0 : i32
    return %arg0, %c0_i32 : i32, i32
  }
  func.func @transform_1(%arg0: i32) -> (i32, i32) {
    %c0_i32 = arith.constant 0 : i32
    %c0_i32_0 = arith.constant 0 : i32
    %c0_i32_1 = arith.constant 0 : i32
    return %c0_i32, %c0_i32_0 : i32, i32
  }
  func.func @transform_2(%arg0: i32) -> (i32, i32) {
    %c0_i32 = arith.constant 0 : i32
    %c0_i32_0 = arith.constant 0 : i32
    %c0_i32_1 = arith.constant 0 : i32
    return %c0_i32, %c0_i32_0 : i32, i32
  }
  func.func @transform_3(%arg0: i32) -> (i32, i32) {
    %c0_i32 = arith.constant 0 : i32
    %c0_i32_0 = arith.constant 0 : i32
    return %c0_i32, %arg0 : i32, i32
  }
}

</mosaic_0001>

<bundles_post_ra>
// kernel: tpu_custom_call.1
= control target key start
LH: loop header
LB: loop body
LE: loop exit
PB: predicated region body
PF: predicated region fallthrough
CT: control target
= control target key end

     0   :  { %8 = vsyncpa [#allocation3], 0  ;;  %s465_s0 = inlined_call_operand.hbm [shape: f32[8,32], index: 0, kind: input, shape index: {}]   ;;  %s466_s1 = inlined_call_operand.vmem [shape: f32[2,32], index: 1, kind: input, shape index: {}]   ;;  %s467_s2 = inlined_call_operand.vmem [shape: f32[2,1], index: 2, kind: input, shape index: {}]   ;;  %s468_s3 = inlined_call_operand.hbm [shape: f32[2,8], index: 3, kind: output, shape index: {}]  }
   0x1   :  { %9 = vsyncpa [#allocation4], 0 }
   0x2   :  { %14 = vsyncadd [#allocation3], 1920  ;;  %s384_s12 = smov [#allocation2]   ;;  %s336_s16 = scalar_lea.hbm %s465_s0, 128 }
   0x3   :  { %s15_s13 = sshll.u32 %s384_s12, 4  ;;  %p337_p0 = scmp.ne.s32.totalorder %s465_s0, %s336_s16  ;;  %s16_s13 = int_to_ptr.vmem [resolvable:$true] %s15_s13 }
   0x4   :  { %p340_p1 = scmp.lt.u32.totalorder %s336_s16, %s465_s0 }
   0x6   :  { %p342_p2 = pnand %p340_p1, %p337_p0 }
   0x8   :  { %345 = shalt.err (!%p342_p2)
}
   0x9   :  { %s346_s21 = scalar_lea.vmem %s16_s13, 128  ;;  %s350_s22 = scalar_lea.vmem %s16_s13, 2048 }
   0xa   :  { %p347_p3 = scmp.ne.s32.totalorder %s16_s13, %s346_s21  ;;  %p351_p4 = scmp.lt.s32.totalorder %s16_s13, %s16_s13 }
   0xb   :  { %p352_p5 = scmp.lt.s32.totalorder %s350_s22, %s346_s21 }
   0xd   :  { %p353_p6 = por %p352_p5, %p351_p4 }
   0xf   :  { %p354_p7 = pnand %p353_p6, %p347_p3 }
  0x11   :  { %357 = shalt.err (!%p354_p7)
}
  0x12   :  { %s385_s23 = smov 128   ;;  %s386_s24 = smov 8  }
  0x13   :  { %21 = dma.hbm_to_vmem [thread:$0]  %s465_s0, 128, %s16_s13, [#allocation3], %s385_s23, %s385_s23, %s386_s24  }
  0x14   :  { %380 = dma.done.wait [#allocation3], 2048  }
  0x15   :  { %381 = vsyncadd [#allocation3], 4294965248  ;;  %v387_v0 = vmov 0.0|0.0   ;;  %vm388_vm0 = vmmov 0   ;;  %v389_v1 = vmov 0.0   ;;  %v390_v2 = vmov 0  }
  0x16   :  { %289 = vmatprep.subr.bf16.mxu0 %v387_v0  ;;  %286 = vmatprep.mubr.msk.f32.mxu0 %vm388_vm0, %v389_v1  ;;  %vm52_vm1 = vcmask 261120   ;;  %v29_v3 = vld [vmem:[#allocation2] sm:$0xff]  ;;  %v30_v4 = vld [vmem:[#allocation2 + $0x8] sm:$0xff]  ;;  %v31_v7 = vld [vmem:[#allocation2 + $0x10] sm:$0xff] }
  0x17   :  { %329 = vset.pattern.permute.xlu0 %v390_v2  ;;  %vm426_vm2 = vmpackc.low %vm52_vm1, %vm52_vm1  ;;  %v290_v6 = vpack.c.bf16 %v30_v4, %v29_v3  ;;  %v32_v8 = vld [vmem:[#allocation2 + $0x18] sm:$0xff]  ;;  %v46_v9 = vld [vmem:[%s467_s2] sm:$0x3] }
  0x18   :  { %49 = vperm.xlu0 %329, %v46_v9   ;;  %v294_v10 = vpack.c.bf16 %v32_v8, %v31_v7  ;;  %v33_v11 = vld [vmem:[#allocation2 + $0x20] sm:$0xff]  ;;  %v34_v12 = vld [vmem:[#allocation2 + $0x28] sm:$0xff]  ;;  %v35_v14 = vld [vmem:[#allocation2 + $0x30] sm:$0xff] }
  0x19   :  { %292 = vmatpush3.bf16.xpose.msk.msra.mxu0 %vm426_vm2, %v290_v6  ;;  %v298_v13 = vpack.c.bf16 %v34_v12, %v33_v11  ;;  %v36_v15 = vld [vmem:[#allocation2 + $0x38] sm:$0xff]  ;;  %v37_v17 = vld [vmem:[#allocation2 + $0x40] sm:$0xff]  ;;  %v38_v18 = vld [vmem:[#allocation2 + $0x48] sm:$0xff] }
  0x1a   :  { %293 = vmatprep.subr.bf16.mxu0 %v387_v0  ;;  %v302_v16 = vpack.c.bf16 %v36_v15, %v35_v14  ;;  %v306_v19 = vpack.c.bf16 %v38_v18, %v37_v17  ;;  %v39_v20 = vld [vmem:[#allocation2 + $0x50] sm:$0xff]  ;;  %v40_v21 = vld [vmem:[#allocation2 + $0x58] sm:$0xff]  ;;  %v41_v23 = vld [vmem:[#allocation2 + $0x60] sm:$0xff] }
  0x1b   :  { %v310_v22 = vpack.c.bf16 %v40_v21, %v39_v20  ;;  %v42_v24 = vld [vmem:[#allocation2 + $0x68] sm:$0xff]  ;;  %v43_v26 = vld [vmem:[#allocation2 + $0x70] sm:$0xff]  ;;  %v44_v27 = vld [vmem:[#allocation2 + $0x78] sm:$0xff] }
  0x1c   :  { %v314_v25 = vpack.c.bf16 %v42_v24, %v41_v23  ;;  %v318_v28 = vpack.c.bf16 %v44_v27, %v43_v26  ;;  %v45_v29 = vld [vmem:[%s466_s1] sm:$0x3]  ;;  %s391_s1 = smov [#allocation5]  }
  0x1d   :  { %s211_s29 = sshll.u32 %s391_s1, 4  ;;  %s212_s29 = int_to_ptr.vmem [resolvable:$true] %s211_s29 }
  0x1e   :  { %s358_s30 = scalar_lea.vmem %s212_s29, 32  ;;  %p363_p9 = scmp.lt.s32.totalorder %s212_s29, %s212_s29 }
  0x1f   :  { %p359_p8 = scmp.ne.s32.totalorder %s212_s29, %s358_s30  ;;  %p364_p10 = scmp.lt.s32.totalorder %s358_s30, %s358_s30 }
  0x21   :  { %296 = vmatpush3.bf16.xpose.msk.msra.mxu0 %vm426_vm2, %v294_v10  ;;  %p365_p11 = por %p364_p10, %p363_p9 }
  0x22   :  { %297 = vmatprep.subr.bf16.mxu0 %v387_v0 }
  0x23   :  { %p366_p12 = pnand %p365_p11, %p359_p8 }
  0x29   :  { %300 = vmatpush3.bf16.xpose.msk.msra.mxu0 %vm426_vm2, %v298_v13 }
  0x2a   :  { %301 = vmatprep.subr.bf16.mxu0 %v387_v0 }
  0x31   :  { %304 = vmatpush3.bf16.xpose.msk.msra.mxu0 %vm426_vm2, %v302_v16 }
  0x32   :  { %305 = vmatprep.subr.bf16.mxu0 %v387_v0 }
  0x39   :  { %308 = vmatpush3.bf16.xpose.msk.msra.mxu0 %vm426_vm2, %v306_v19 }
  0x3a   :  { %309 = vmatprep.subr.bf16.mxu0 %v387_v0 }
  0x41   :  { %312 = vmatpush3.bf16.xpose.msk.msra.mxu0 %vm426_vm2, %v310_v22 }
  0x42   :  { %313 = vmatprep.subr.bf16.mxu0 %v387_v0 }
  0x49   :  { %316 = vmatpush3.bf16.xpose.msk.msra.mxu0 %vm426_vm2, %v314_v25 }
  0x4a   :  { %317 = vmatprep.subr.bf16.mxu0 %v387_v0 }
  0x51   :  { %320 = vmatpush3.bf16.xpose.msk.msra.mxu0 %vm426_vm2, %v318_v28 }
  0x58   :  { %287 = vmatmul.mubr.msk.f32.vlgmr.msra.gmra.mrb[0].mxu0 %vm52_vm1, %v45_v29 }
  0x97   :  { %v50_v30 = vpop.permute.xlu0 %49 }
 0x12b   :  { %v170_v31 = vpop.f32.mrb[0].mxu0 }
 0x12c   :  { %v171_v32 = vadd.f32 %v170_v31, %v50_v30  ;;  %v288_v33 = vpop.f32.mrb[1].mxu0 }
 0x12e   :  { %vm174_vm3 = vcmp.ge.f32.partialorder %v171_v32, 0.0  ;;  %v175_v34 = vmul.f32 0.01, %v171_v32 }
 0x130   :  { %v176_v35 = vsel %vm174_vm3, %v171_v32, %v175_v34 }
 0x131   :  { %v178_v36 = vrot.slane %v176_v35, 1 }
 0x133   :  { %v180_v37 = vmax.f32 %v176_v35, %v178_v36 }
 0x135   :  { %v181_v38 = vsub.f32 %v176_v35, %v180_v37  ;;  %v185_v39 = vrot.slane %v180_v37, 7 }
 0x137   :  { %v187_v40 = vsub.f32 %v176_v35, %v185_v39  ;;  %v182_v41 = vmul.f32 1.442695, %v181_v38 }
 0x139   :  { %v188_v42 = vmul.f32 1.442695, %v187_v40 }
 0x13b   :  { %330 = vpow2.f32 %v188_v42 }
 0x13c   :  { %332 = vpow2.f32 %v182_v41 }
 0x145   :  { %v331_v43 = vpop.eup %330 }
 0x146   :  { %v191_v44 = vrot.slane %v331_v43, 1  ;;  %v333_v45 = vpop.eup %332 }
 0x148   :  { %v193_v46 = vadd.f32 %v333_v45, %v191_v44 }
 0x14a   :  { %334 = vrcp.f32 %v193_v46 }
 0x154   :  { %v335_v47 = vpop.eup %334 }
 0x155   :  { %v195_v48 = vmul.f32 %v335_v47, %v193_v46 }
 0x157   :  { %v196_v49 = vsub.f32 2.0, %v195_v48 }
 0x159   :  { %v197_v50 = vmul.f32 %v335_v47, %v196_v49 }
 0x15b   :  { %v198_v51 = vmul.f32 %v333_v45, %v197_v50  ;;  %v201_v52 = vrot.slane %v197_v50, 7 }
 0x15d   :  { %199 = vst [vmem:[#allocation5] sm:$0x1] %v198_v51  ;;  %v203_v53 = vmul.f32 %v331_v43, %v201_v52 }
 0x15f   :  { %204 = vst [vmem:[#allocation5] sm:$0x2] %v203_v53 }
 0x160   :  { %369 = shalt.err (!%p366_p12)
}
 0x161   :  { %s370_s6 = scalar_lea.hbm %s468_s3, 32 }
 0x162   :  { %p371_p13 = scmp.ne.s32.totalorder %s468_s3, %s370_s6  ;;  %p374_p0 = scmp.lt.u32.totalorder %s370_s6, %s468_s3 }
 0x164   :  { %p376_p1 = pnand %p374_p0, %p371_p13 }
 0x166   :  { %379 = shalt.err (!%p376_p1)
}
 0x167   :  { %214 = dma.vmem_to_hbm [thread:$0]  %s212_s29, 32, %s468_s3, [#allocation4]  }
 0x168   :  { %382 = dma.done.wait [#allocation4], 32  }
 0x169   :  { %383 = vsyncadd [#allocation4], 4294967264 }
 0x16a   :  { %218 = vsyncpa [#allocation3], 1 }
 0x16b   :  { %219 = vsyncpa [#allocation4], 1 }

</bundles_post_ra>
